<compile_context>
chip_gen: v7x
topology: tpu7x:2x2x1
jax: 0.10.0
libtpu: 0.0.40
codegen_flags: <defaults>
</compile_context>

<pallas_src>
import jax
import jax.numpy as jnp
from jax.experimental import pallas as pl
from jax.experimental.pallas import tpu as pltpu


def _round_up(v, m):
    return ((v + m - 1) // m) * m


def _encoder_kernel(x_ref, w_ref, b_ref, o_ref, acc_ref):
    # x_ref: (tm, tk)  w_ref: (tk, tn)  b_ref: (1, tn)
    # o_ref: (tm, tn)  acc_ref: (tm, tn) f32 scratch
    k = pl.program_id(2)

    @pl.when(k == 0)
    def _():
        acc_ref[...] = jnp.zeros_like(acc_ref)

    x = x_ref[...]
    w = w_ref[...]
    if x.dtype != w.dtype:
        # free VPU cast hidden under DMA; lets persistent bf16 weights drive
        # the bf16 MXU without a wrapper-side cast round trip through HBM.
        x = x.astype(w.dtype)
    acc_ref[...] += jnp.dot(x, w, preferred_element_type=jnp.float32)

    @pl.when(k == pl.num_programs(2) - 1)
    def _():
        y = acc_ref[...] + b_ref[...].astype(jnp.float32)   # f32 epilogue
        o_ref[...] = jnp.tanh(y).astype(o_ref.dtype)


def _vmem_budget_bytes():
    cap = None
    try:
        cap = getattr(pltpu.get_tpu_info(), "vmem_capacity_bytes", None)
    except Exception:
        cap = None
    if cap is None:
        cap = 64 * 1024 * 1024          # conservative default (v7x per-TC)
    return int(cap) * 3 // 4            # ~96 MiB v5e/v6e, ~48 MiB v7x


def _choose_tiles(M, N, K, in_bytes, out_bytes, budget):
    tn = min(512, _round_up(N, 128))
    tm_target = 1024 if K <= 512 else 512      # bigger row tiles when mem-bound
    tm = min(tm_target, _round_up(M, 8))
    tk = K                                      # full K if it fits

    def fits(tm_, tn_, tk_):
        fp = (2 * (tm_ * tk_ + tk_ * tn_) * in_bytes   # x + w double buffered
              + 2 * tn_ * 4                            # bias (f32) double buffered
              + 2 * tm_ * tn_ * out_bytes              # output double buffered
              + tm_ * tn_ * 4)                         # f32 accumulator scratch
        return fp <= budget

    while not fits(tm, tn, tk) and tk > 512:
        tk = max(512, _round_up(tk // 2, 128))
    while not fits(tm, tn, tk) and tm > 64:
        tm = max(64, _round_up(tm // 2, 8))
    while not fits(tm, tn, tk) and tn > 128:
        tn = max(128, _round_up(tn // 2, 128))

    # try to make tm divide M exactly -> no pad + no post-kernel slice traffic
    if M > tm and M % tm != 0:
        for cand in range(tm, max(tm - 256, 63), -8):
            if M % cand == 0:
                tm = cand
                break
    return tm, tn, tk


def encoder_forward(x, weight_t, bias, *, tm=None, tn=None, tk=None):
    """SVAE Encoder forward: tanh(x @ weight_t + bias).

    x:        [..., rnn_size]
    weight_t: [rnn_size, hidden_size]  (pre-transposed ONCE at init; avoids a
              per-grid-step on-chip transpose of the weight slab)
    bias:     [hidden_size]
    """
    orig_shape = x.shape
    K = orig_shape[-1]
    assert weight_t.shape[0] == K, "weight_t must be [rnn_size, hidden_size]"
    N = weight_t.shape[1]
    out_dtype = x.dtype

    x2d = x.reshape(-1, K)
    M = x2d.shape[0]

    in_bytes = max(jnp.dtype(x2d.dtype).itemsize, jnp.dtype(weight_t.dtype).itemsize)
    out_bytes = jnp.dtype(out_dtype).itemsize
    budget = _vmem_budget_bytes()

    a_tm, a_tn, a_tk = _choose_tiles(M, N, K, in_bytes, out_bytes, budget)
    user_tm = tm is not None
    tm = a_tm if tm is None else _round_up(min(tm, _round_up(M, 8)), 8)
    tn = a_tn if tn is None else _round_up(min(tn, _round_up(N, 128)), 128)
    if tk is None:
        tk = a_tk
    else:
        tk = K if tk >= K else _round_up(tk, 128)
        if tk >= K:
            tk = K

    Mp = _round_up(M, tm)
    Np = _round_up(N, tn)
    Kp = K if tk == K else _round_up(K, tk)
    gi, gj, gk = Mp // tm, Np // tn, Kp // tk

    # v7x megacore: make sure >=2 parallel tiles exist when there is real work
    if (not user_tm) and gi * gj == 1 and M >= 512:
        tm = _round_up((M + 1) // 2, 8)
        Mp = _round_up(M, tm)
        gi = Mp // tm

    # pad so every tile is full; zero rows/cols contribute nothing to the dot
    # and are sliced off below.  (For best perf, pre-pad weights at init.)
    if Mp != M or Kp != K:
        x2d = jnp.pad(x2d, ((0, Mp - M), (0, Kp - K)))
    if Np != N or Kp != K:
        weight_t = jnp.pad(weight_t, ((0, Kp - K), (0, Np - N)))
    b2d = bias.astype(jnp.float32)
    if Np != N:
        b2d = jnp.pad(b2d, ((0, Np - N),))
    b2d = b2d.reshape(1, Np)

    # Grid order: the operand indexed by the OUTER spatial axis is fetched
    # exactly once; the operand indexed by the inner axis is re-streamed
    # (outer-extent) times.  Put the larger operand on the outer axis.
    rows_outer = (M * K) >= (N * K)
    if rows_outer:
        grid = (gi, gj, gk)
        x_map = lambda a, b, k: (a, k)
        w_map = lambda a, b, k: (k, b)
        b_map = lambda a, b, k: (0, b)
        o_map = lambda a, b, k: (a, b)
    else:
        grid = (gj, gi, gk)
        x_map = lambda a, b, k: (b, k)
        w_map = lambda a, b, k: (k, a)
        b_map = lambda a, b, k: (0, a)
        o_map = lambda a, b, k: (b, a)

    out = pl.pallas_call(
        _encoder_kernel,
        out_shape=jax.ShapeDtypeStruct((Mp, Np), out_dtype),
        grid_spec=pltpu.PrefetchScalarGridSpec(
            num_scalar_prefetch=0,
            grid=grid,
            in_specs=[
                pl.BlockSpec((tm, tk), x_map),     # activations
                pl.BlockSpec((tk, tn), w_map),     # weight, already [K, N]
                pl.BlockSpec((1, tn), b_map),      # bias slab (f32)
            ],
            out_specs=pl.BlockSpec((tm, tn), o_map),
            scratch_shapes=[pltpu.VMEM((tm, tn), jnp.float32)],
        ),
        compiler_params=pltpu.CompilerParams(
            # spatial axes independent (megacore-shardable); K is a reduction
            dimension_semantics=("parallel", "parallel", "arbitrary"),
            vmem_limit_bytes=budget,
        ),
    )(x2d, weight_t, b2d)

    if Mp != M or Np != N:
        out = out[:M, :N]
    return out.reshape(*orig_shape[:-1], N)


def init_encoder_params(key, rnn_size, hidden_size, dtype=jnp.float32,
                        param_dtype=None):
    """Mirror nn.Linear + xavier_normal_; the weight is returned PRE-TRANSPOSED
    as [rnn_size, hidden_size] (transposed once here, outside the hot path).
    param_dtype: optionally store the weight persistently in e.g. bf16."""
    k_w, k_b = jax.random.split(key)
    std = (2.0 / (rnn_size + hidden_size)) ** 0.5          # xavier normal
    weight = std * jax.random.normal(k_w, (hidden_size, rnn_size), dtype=dtype)
    bound = 1.0 / (rnn_size ** 0.5)                         # nn.Linear bias init
    bias = jax.random.uniform(k_b, (hidden_size,), minval=-bound, maxval=bound,
                              dtype=dtype)
    weight_t = weight.T                                     # one-time transpose
    if param_dtype is not None:
        weight_t = weight_t.astype(param_dtype)
    return weight_t, bias


if __name__ == "__main__":
    key = jax.random.PRNGKey(0)
    k_x, k_p = jax.random.split(key)

    batch, seq, rnn_size, hidden_size = 2, 8, 32, 64
    x = jax.random.normal(k_x, (batch, seq, rnn_size), dtype=jnp.float32)
    weight_t, bias = init_encoder_params(k_p, rnn_size, hidden_size)

    out = jax.block_until_ready(encoder_forward(x, weight_t, bias))
    ref = jnp.tanh(x @ weight_t + bias)
    assert out.shape == (batch, seq, hidden_size)
    assert jnp.allclose(out, ref, atol=1e-5, rtol=1e-5)

    # padded-tail path (rows not a multiple of the row tile) + swapped grid order
    x_odd = jax.random.normal(k_x, (3, 7, rnn_size), dtype=jnp.float32)
    out_odd = jax.block_until_ready(encoder_forward(x_odd, weight_t, bias, tm=16))
    ref_odd = jnp.tanh(x_odd @ weight_t + bias)
    assert jnp.allclose(out_odd, ref_odd, atol=1e-5, rtol=1e-5)

    # persistent-bf16 weight path (in-kernel x cast, f32 accumulate/epilogue)
    w_bf16, bias_b = init_encoder_params(k_p, rnn_size, hidden_size,
                                         param_dtype=jnp.bfloat16)
    out_bf = jax.block_until_ready(encoder_forward(x, w_bf16, bias_b))
    ref_bf = jnp.tanh(
        jnp.dot(x.astype(jnp.bfloat16).reshape(-1, rnn_size), w_bf16,
                preferred_element_type=jnp.float32
                ).reshape(batch, seq, hidden_size)
        + bias_b)
    assert jnp.allclose(out_bf, ref_bf, atol=1e-3, rtol=1e-3)

    print("KERNEL_OK")
</pallas_src>

<mosaic_0001>
module attributes {stable_mosaic.version = 11 : i64} {
  func.func @_encoder_kernel(%arg0: i32, %arg1: i32, %arg2: i32, %arg3: memref<16x32xf32, #tpu.memory_space<vmem>>, %arg4: memref<32x128xf32, #tpu.memory_space<vmem>>, %arg5: memref<1x128xf32, #tpu.memory_space<vmem>>, %arg6: memref<16x128xf32, #tpu.memory_space<vmem>>, %arg7: memref<16x128xf32, #tpu.memory_space<vmem>>) attributes {dimension_semantics = [#tpu.dimension_semantics<parallel>, #tpu.dimension_semantics<parallel>, #tpu.dimension_semantics<arbitrary>], iteration_bounds = array<i64: 1, 1, 1>, scalar_prefetch = 0 : i64, scratch_operands = 1 : i64, tpu.core_type = #tpu.core_type<tc>, window_params = [{transform_indices = @transform_0, window_bounds = array<i64: 16, 32>}, {transform_indices = @transform_1, window_bounds = array<i64: 32, 128>}, {transform_indices = @transform_2, window_bounds = array<i64: 1, 128>}, {transform_indices = @transform_3, window_bounds = array<i64: 16, 128>}]} {
    %c0_i32 = arith.constant 0 : i32
    %0 = arith.cmpi eq, %arg2, %c0_i32 : i32
    %1 = arith.extui %0 : i1 to i32
    %c0_i32_0 = arith.constant 0 : i32
    %2 = arith.cmpi ne, %1, %c0_i32_0 : i32
    scf.if %2 {
      %cst_10 = arith.constant 0.000000e+00 : f32
      %12 = vector.broadcast %cst_10 : f32 to vector<16x128xf32>
      %c0_11 = arith.constant 0 : index
      %c0_12 = arith.constant 0 : index
      %13 = vector.load %arg7[%c0_11, %c0_12] : memref<16x128xf32, #tpu.memory_space<vmem>>, vector<16x128xf32>
      tpu.vector_store %arg7[%c0_11, %c0_12], %12 {strides = array<i32>} : memref<16x128xf32, #tpu.memory_space<vmem>>, vector<16x128xf32>,
    } else {
    }
    %c0 = arith.constant 0 : index
    %c0_1 = arith.constant 0 : index
    %3 = vector.load %arg3[%c0, %c0_1] : memref<16x32xf32, #tpu.memory_space<vmem>>, vector<16x32xf32>
    %c0_2 = arith.constant 0 : index
    %c0_3 = arith.constant 0 : index
    %4 = vector.load %arg4[%c0_2, %c0_3] : memref<32x128xf32, #tpu.memory_space<vmem>>, vector<32x128xf32>
    %c0_4 = arith.constant 0 : index
    %c0_5 = arith.constant 0 : index
    %5 = vector.load %arg7[%c0_4, %c0_5] : memref<16x128xf32, #tpu.memory_space<vmem>>, vector<16x128xf32>
    %cst = arith.constant dense<0.000000e+00> : vector<16x128xf32>
    %6 = tpu.matmul %3, %4, %cst {dimension_numbers = #tpu.dot_dimension_numbers<[1], [0], [0], [1], [0, 0, 1, 1], [], []>} : vector<16x32xf32>, vector<32x128xf32>, vector<16x128xf32> -> vector<16x128xf32>
    %7 = arith.addf %5, %6 : vector<16x128xf32>
    %c0_6 = arith.constant 0 : index
    %c0_7 = arith.constant 0 : index
    %8 = vector.load %arg7[%c0_6, %c0_7] : memref<16x128xf32, #tpu.memory_space<vmem>>, vector<16x128xf32>
    tpu.vector_store %arg7[%c0_6, %c0_7], %7 {strides = array<i32>} : memref<16x128xf32, #tpu.memory_space<vmem>>, vector<16x128xf32>,
    %c0_i32_8 = arith.constant 0 : i32
    %9 = arith.cmpi eq, %arg2, %c0_i32_8 : i32
    %10 = arith.extui %9 : i1 to i32
    %c0_i32_9 = arith.constant 0 : i32
    %11 = arith.cmpi ne, %10, %c0_i32_9 : i32
    scf.if %11 {
      %c0_10 = arith.constant 0 : index
      %c0_11 = arith.constant 0 : index
      %12 = vector.load %arg7[%c0_10, %c0_11] : memref<16x128xf32, #tpu.memory_space<vmem>>, vector<16x128xf32>
      %c0_12 = arith.constant 0 : index
      %c0_13 = arith.constant 0 : index
      %13 = vector.load %arg5[%c0_12, %c0_13] : memref<1x128xf32, #tpu.memory_space<vmem>>, vector<1x128xf32>
      %14 = vector.broadcast %13 : vector<1x128xf32> to vector<16x128xf32>
      %15 = arith.addf %12, %14 : vector<16x128xf32>
      %16 = math.tanh %15 : vector<16x128xf32>
      %c0_14 = arith.constant 0 : index
      %c0_15 = arith.constant 0 : index
      %17 = vector.load %arg6[%c0_14, %c0_15] : memref<16x128xf32, #tpu.memory_space<vmem>>, vector<16x128xf32>
      tpu.vector_store %arg6[%c0_14, %c0_15], %16 {strides = array<i32>} : memref<16x128xf32, #tpu.memory_space<vmem>>, vector<16x128xf32>,
    } else {
    }
    return
  }
  func.func @transform_0(%arg0: i32, %arg1: i32, %arg2: i32) -> (i32, i32) {
    %c0_i32 = arith.constant 0 : i32
    return %arg1, %arg2 : i32, i32
  }
  func.func @transform_1(%arg0: i32, %arg1: i32, %arg2: i32) -> (i32, i32) {
    %c0_i32 = arith.constant 0 : i32
    return %arg2, %arg0 : i32, i32
  }
  func.func @transform_2(%arg0: i32, %arg1: i32, %arg2: i32) -> (i32, i32) {
    %c0_i32 = arith.constant 0 : i32
    %c0_i32_0 = arith.constant 0 : i32
    return %c0_i32, %arg0 : i32, i32
  }
  func.func @transform_3(%arg0: i32, %arg1: i32, %arg2: i32) -> (i32, i32) {
    %c0_i32 = arith.constant 0 : i32
    return %arg1, %arg0 : i32, i32
  }
}

</mosaic_0001>

<bundles_post_ra>
// kernel: tpu_custom_call.1
= control target key start
LH: loop header
LB: loop body
LE: loop exit
PB: predicated region body
PF: predicated region fallthrough
CT: control target
= control target key end

     0   :  { %8 = vsyncpa [#allocation4], 0  ;;  %s361_s0 = inlined_call_operand.hbm [shape: f32[16,32], index: 0, kind: input, shape index: {}]   ;;  %s362_s1 = inlined_call_operand.hbm [shape: f32[32,128], index: 1, kind: input, shape index: {}]   ;;  %s363_s2 = inlined_call_operand.vmem [shape: f32[1,128], index: 2, kind: input, shape index: {}]   ;;  %s364_s3 = inlined_call_operand.hbm [shape: f32[16,128], index: 3, kind: output, shape index: {}]  }
   0x1   :  { %9 = vsyncpa [#allocation7], 0 }
   0x2   :  { %10 = vsyncpa [#allocation5], 0  ;;  %s288_s12 = smov [#allocation3]   ;;  %s216_s16 = scalar_lea.hbm %s361_s0, 256 }
   0x3   :  { %s16_s13 = sshll.u32 %s288_s12, 4  ;;  %p217_p0 = scmp.ne.s32.totalorder %s361_s0, %s216_s16  ;;  %s17_s13 = int_to_ptr.vmem [resolvable:$true] %s16_s13 }
   0x4   :  { %p220_p1 = scmp.lt.u32.totalorder %s216_s16, %s361_s0 }
   0x6   :  { %p222_p2 = pnand %p220_p1, %p217_p0 }
   0x8   :  { %225 = shalt.err (!%p222_p2)
}
   0x9   :  { %s226_s21 = scalar_lea.vmem %s17_s13, 256  ;;  %p231_p4 = scmp.lt.s32.totalorder %s17_s13, %s17_s13 }
   0xa   :  { %p227_p3 = scmp.ne.s32.totalorder %s17_s13, %s226_s21  ;;  %p232_p5 = scmp.lt.s32.totalorder %s226_s21, %s226_s21 }
   0xc   :  { %p233_p6 = por %p232_p5, %p231_p4 }
   0xe   :  { %p234_p7 = pnand %p233_p6, %p227_p3 }
  0x10   :  { %237 = shalt.err (!%p234_p7)
}
  0x11   :  { %s289_s22 = smov 128   ;;  %s290_s23 = smov 8  }
  0x12   :  { %22 = dma.hbm_to_vmem [thread:$0]  %s361_s0, 256, %s17_s13, [#allocation4], %s289_s22, %s289_s22, %s290_s23  }
  0x13   :  { %s291_s26 = smov [#allocation6]   ;;  %s238_s30 = scalar_lea.hbm %s362_s1, 512 }
  0x14   :  { %s28_s27 = sshll.u32 %s291_s26, 4  ;;  %p239_p8 = scmp.ne.s32.totalorder %s362_s1, %s238_s30  ;;  %s29_s27 = int_to_ptr.vmem [resolvable:$true] %s28_s27 }
  0x15   :  { %p242_p9 = scmp.lt.u32.totalorder %s238_s30, %s362_s1 }
  0x17   :  { %p244_p10 = pnand %p242_p9, %p239_p8 }
  0x19   :  { %247 = shalt.err (!%p244_p10)
}
  0x1a   :  { %s248_s8 = scalar_lea.vmem %s29_s27, 512  ;;  %p253_p12 = scmp.lt.s32.totalorder %s29_s27, %s29_s27 }
  0x1b   :  { %p249_p11 = scmp.ne.s32.totalorder %s29_s27, %s248_s8  ;;  %p254_p13 = scmp.lt.s32.totalorder %s248_s8, %s248_s8 }
  0x1d   :  { %p255_p0 = por %p254_p13, %p253_p12 }
  0x1f   :  { %p256_p1 = pnand %p255_p0, %p249_p11 }
  0x21   :  { %259 = shalt.err (!%p256_p1)
}
  0x22   :  { %34 = dma.hbm_to_vmem [thread:$0]  %s362_s1, 512, %s29_s27, [#allocation7], %s289_s22, %s289_s22, %s290_s23  }
  0x23   :  { %282 = dma.done.wait [#allocation4], 256  }
  0x24   :  { %283 = vsyncadd [#allocation4], 4294967040 }
  0x25   :  { %284 = dma.done.wait [#allocation7], 512  }
  0x26   :  { %285 = vsyncadd [#allocation7], 4294966784  ;;  %vm57_vm0 = vcmask 261120   ;;  %v51_v0 = vld [vmem:[#allocation6] sm:$0xff]  ;;  %v52_v1 = vld [vmem:[#allocation6 + $0x8] sm:$0xff]  ;;  %s292_s11 = smov [#allocation8]  }
  0x27   :  { %v53_v2 = vld [vmem:[#allocation6 + $0x10] sm:$0xff]  ;;  %v199_v3 = vpack.c.bf16 %v52_v1, %v51_v0  ;;  %v54_v4 = vld [vmem:[#allocation6 + $0x18] sm:$0xff]  ;;  %s166_s12 = sshll.u32 %s292_s11, 4  ;;  %s167_s12 = int_to_ptr.vmem [resolvable:$true] %s166_s12 }
  0x28   :  { %v49_v5 = vld [vmem:[#allocation3] sm:$0xff]  ;;  %v203_v6 = vpack.c.bf16 %v54_v4, %v53_v2  ;;  %v50_v7 = vld [vmem:[#allocation3 + $0x8] sm:$0xff]  ;;  %s260_s13 = scalar_lea.vmem %s167_s12, 256  ;;  %p265_p3 = scmp.lt.s32.totalorder %s167_s12, %s167_s12 }
  0x29   :  { %196 = vmatprep.mubr.msk.f32.mxu0 %vm57_vm0, %v49_v5  ;;  %200 = vmatprep.subr.bf16.mxu0 %v199_v3  ;;  %v181_v8 = vld [vmem:[%s363_s2] ss:$0 sm:$0xff]  ;;  %p261_p2 = scmp.ne.s32.totalorder %s167_s12, %s260_s13  ;;  %p266_p4 = scmp.lt.s32.totalorder %s260_s13, %s260_s13 }
  0x2a   :  { %202 = vmatpush3.bf16.msra.mxu0 %v199_v3 }
  0x2b   :  { %204 = vmatprep.subr.bf16.mxu0 %v203_v6  ;;  %p267_p5 = por %p266_p4, %p265_p3 }
  0x2d   :  { %p268_p6 = pnand %p267_p5, %p261_p2 }
  0x2e   :  { %206 = vmatpush3.bf16.msra.mxu0 %v203_v6 }
  0x31   :  { %197 = vmatmul.mubr.msk.f32.vlgmr.msra.gmra.mrb[0].mxu0 %vm57_vm0, %v50_v7 }
 0x104   :  { %v198_v9 = vpop.f32.mrb[0].mxu0 }
 0x105   :  { %v156_v10 = vadd.f32 %v198_v9, %v181_v8  ;;  %v130_v11 = vpop.f32.mrb[1].mxu0 }
 0x106   :  { %v155_v12 = vadd.f32 %v181_v8, %v130_v11 }
 0x107   :  { %212 = vtanh.f32 %v156_v10 }
 0x108   :  { %214 = vtanh.f32 %v155_v12 }
 0x111   :  { %v213_v13 = vpop.eup %212 }
 0x112   :  { %v215_v14 = vpop.eup %214  ;;  %160 = vst [vmem:[#allocation8 + $0x8] sm:$0xff] %v213_v13 }
 0x113   :  { %159 = vst [vmem:[#allocation8] sm:$0xff] %v215_v14 }
 0x114   :  { %271 = shalt.err (!%p268_p6)
}
 0x115   :  { %s272_s15 = scalar_lea.hbm %s364_s3, 256 }
 0x116   :  { %p273_p7 = scmp.ne.s32.totalorder %s364_s3, %s272_s15  ;;  %p276_p8 = scmp.lt.u32.totalorder %s272_s15, %s364_s3 }
 0x118   :  { %p278_p9 = pnand %p276_p8, %p273_p7 }
 0x11a   :  { %281 = shalt.err (!%p278_p9)
}
 0x11b   :  { %172 = dma.vmem_to_hbm [thread:$0]  %s167_s12, 256, %s364_s3, [#allocation5], %s289_s22, %s289_s22, %s290_s23  }
 0x11c   :  { %286 = dma.done.wait [#allocation5], 256  }
 0x11d   :  { %287 = vsyncadd [#allocation5], 4294967040 }
 0x11e   :  { %176 = vsyncpa [#allocation4], 1 }
 0x11f   :  { %177 = vsyncpa [#allocation7], 1 }
 0x120   :  { %178 = vsyncpa [#allocation5], 1 }

</bundles_post_ra>
